<compile_context>
chip_gen: v5e
topology: v5e:2x2
jax: 0.10.0
libtpu: 0.0.40
codegen_flags: <defaults>
</compile_context>

<pallas_src>
import jax
import jax.numpy as jnp
from jax.experimental import pallas as pl
from jax.experimental.pallas import tpu as pltpu


def _mse_sum_to_samples_kernel(x_ref, t_ref, o_ref, acc_ref):
    d = pl.program_id(1)

    @pl.when(d == 0)
    def _():
        acc_ref[...] = jnp.zeros_like(acc_ref)

    # Upcast in-kernel (VPU has huge slack here); keep HBM traffic narrow.
    x = x_ref[...].astype(jnp.float32)
    t = t_ref[...].astype(jnp.float32)
    diff = x - t
    acc_ref[...] += jnp.sum(diff * diff, axis=1, keepdims=True)

    @pl.when(d == pl.num_programs(1) - 1)
    def _():
        o_ref[...] = acc_ref[...]


def _round_up(v, m):
    return ((v + m - 1) // m) * m


def _choose_tiles(N, D, itemsize, vmem_tile_budget_bytes):
    """Pick (tile_n, tile_d) so 2 inputs x 2 buffers x tile fits the budget."""
    max_block_elems = max(vmem_tile_budget_bytes // (4 * itemsize), 8 * 128)
    if D * 8 <= max_block_elems:
        tile_d = D  # whole feature dim in one block (full-dim block is legal)
    else:
        tile_d = max(128, (max_block_elems // 8) // 128 * 128)
    tile_n = max(8, (max_block_elems // tile_d) // 8 * 8)
    tile_n = min(tile_n, _round_up(N, 8))
    return tile_n, tile_d


def mse_custom(x, target, reduction="sum_to_samples", *, tile_n=None, tile_d=None,
               vmem_tile_budget_bytes=32 << 20):
    """Pallas implementation of MSE_custom.forward for 2-D [N, D] inputs."""
    if reduction != "sum_to_samples":
        # TODO(synk): 'mean' / 'sum' / 'none' paths not needed for default module config.
        raise NotImplementedError("only reduction='sum_to_samples' implemented")
    assert x.shape == target.shape and x.ndim == 2
    N, D = x.shape

    auto_tn, auto_td = _choose_tiles(N, D, jnp.dtype(x.dtype).itemsize,
                                     vmem_tile_budget_bytes)
    tn = auto_tn if tile_n is None else tile_n
    td = auto_td if tile_d is None else tile_d
    assert tn % 8 == 0, "tile_n must be a multiple of 8"
    assert td == D or td % 128 == 0, "tile_d must be D or a multiple of 128"

    # Zero-pad ragged N / D (padding contributes 0 to the squared-error sum).
    n_pad = _round_up(N, tn)
    d_pad = _round_up(D, td)
    if (n_pad, d_pad) != (N, D):
        pad = ((0, n_pad - N), (0, d_pad - D))
        x = jnp.pad(x, pad)
        target = jnp.pad(target, pad)

    grid = (n_pad // tn, d_pad // td)

    out = pl.pallas_call(
        _mse_sum_to_samples_kernel,
        out_shape=jax.ShapeDtypeStruct((n_pad, 1), jnp.float32),
        grid_spec=pltpu.PrefetchScalarGridSpec(
            num_scalar_prefetch=0,
            grid=grid,
            in_specs=[
                pl.BlockSpec((tn, td), lambda i, d: (i, d)),
                pl.BlockSpec((tn, td), lambda i, d: (i, d)),
            ],
            out_specs=pl.BlockSpec((tn, 1), lambda i, d: (i, 0)),
            scratch_shapes=[pltpu.VMEM((tn, 1), jnp.float32)],
        ),
        compiler_params=pltpu.CompilerParams(
            dimension_semantics=("parallel", "arbitrary"),
            vmem_limit_bytes=48 << 20,  # <= v7x's 64 MiB, well above default scoped limit
        ),
    )(x, target)
    return out[:N, 0]  # matches torch's .sum(dim=1) -> shape [N]


if __name__ == "__main__":
    key = jax.random.PRNGKey(0)
    k1, k2 = jax.random.split(key)

    # Small shapes consistent with the module: batch of samples x feature dim.
    N, D = 8, 32
    x = jax.random.normal(k1, (N, D), dtype=jnp.float32)
    tgt = jax.random.normal(k2, (N, D), dtype=jnp.float32)

    out = jax.block_until_ready(mse_custom(x, tgt))
    ref = jnp.sum((x - tgt) ** 2, axis=1)
    assert out.shape == (N,)
    assert jnp.allclose(out, ref, rtol=1e-5, atol=1e-5), "mismatch vs reference (f32)"

    # Exercise the padded-N + D-tiled accumulator path with bf16 streaming.
    N2, D2 = 20, 384
    k3, k4 = jax.random.split(k2)
    x2 = jax.random.normal(k3, (N2, D2), dtype=jnp.bfloat16)
    t2 = jax.random.normal(k4, (N2, D2), dtype=jnp.bfloat16)
    out2 = jax.block_until_ready(mse_custom(x2, t2, tile_n=16, tile_d=128))
    ref2 = jnp.sum((x2.astype(jnp.float32) - t2.astype(jnp.float32)) ** 2, axis=1)
    assert out2.shape == (N2,)
    assert jnp.allclose(out2, ref2, rtol=1e-3, atol=1e-3), "mismatch vs reference (bf16)"

    print("KERNEL_OK")
</pallas_src>

<mosaic_0001>
module attributes {stable_mosaic.version = 11 : i64} {
  func.func @_mse_sum_to_samples_kernel(%arg0: i32, %arg1: i32, %arg2: memref<8x32xf32, #tpu.memory_space<vmem>>, %arg3: memref<8x32xf32, #tpu.memory_space<vmem>>, %arg4: memref<8x1xf32, #tpu.memory_space<vmem>>, %arg5: memref<8x1xf32, #tpu.memory_space<vmem>>) attributes {dimension_semantics = [#tpu.dimension_semantics<parallel>, #tpu.dimension_semantics<arbitrary>], iteration_bounds = array<i64: 1, 1>, scalar_prefetch = 0 : i64, scratch_operands = 1 : i64, tpu.core_type = #tpu.core_type<tc>, window_params = [{transform_indices = @transform_0, window_bounds = array<i64: 8, 32>}, {transform_indices = @transform_1, window_bounds = array<i64: 8, 32>}, {transform_indices = @transform_2, window_bounds = array<i64: 8, 1>}]} {
    %c0_i32 = arith.constant 0 : i32
    %0 = arith.cmpi eq, %arg1, %c0_i32 : i32
    %1 = arith.extui %0 : i1 to i32
    %c0_i32_0 = arith.constant 0 : i32
    %2 = arith.cmpi ne, %1, %c0_i32_0 : i32
    scf.if %2 {
      %cst_10 = arith.constant 0.000000e+00 : f32
      %15 = vector.broadcast %cst_10 : f32 to vector<8x1xf32>
      %c0_11 = arith.constant 0 : index
      %c0_12 = arith.constant 0 : index
      %16 = vector.load %arg5[%c0_11, %c0_12] : memref<8x1xf32, #tpu.memory_space<vmem>>, vector<8x1xf32>
      tpu.vector_store %arg5[%c0_11, %c0_12], %15 {strides = array<i32>} : memref<8x1xf32, #tpu.memory_space<vmem>>, vector<8x1xf32>,
    } else {
    }
    %c0 = arith.constant 0 : index
    %c0_1 = arith.constant 0 : index
    %3 = vector.load %arg2[%c0, %c0_1] : memref<8x32xf32, #tpu.memory_space<vmem>>, vector<8x32xf32>
    %c0_2 = arith.constant 0 : index
    %c0_3 = arith.constant 0 : index
    %4 = vector.load %arg3[%c0_2, %c0_3] : memref<8x32xf32, #tpu.memory_space<vmem>>, vector<8x32xf32>
    %5 = arith.subf %3, %4 : vector<8x32xf32>
    %c0_4 = arith.constant 0 : index
    %c0_5 = arith.constant 0 : index
    %6 = vector.load %arg5[%c0_4, %c0_5] : memref<8x1xf32, #tpu.memory_space<vmem>>, vector<8x1xf32>
    %7 = arith.mulf %5, %5 : vector<8x32xf32>
    %cst = arith.constant dense<0.000000e+00> : vector<8xf32>
    %8 = vector.multi_reduction <add>, %7, %cst [1] : vector<8x32xf32> to vector<8xf32>
    %9 = vector.shape_cast %8 : vector<8xf32> to vector<8x1xf32>
    %10 = arith.addf %6, %9 : vector<8x1xf32>
    %c0_6 = arith.constant 0 : index
    %c0_7 = arith.constant 0 : index
    %11 = vector.load %arg5[%c0_6, %c0_7] : memref<8x1xf32, #tpu.memory_space<vmem>>, vector<8x1xf32>
    tpu.vector_store %arg5[%c0_6, %c0_7], %10 {strides = array<i32>} : memref<8x1xf32, #tpu.memory_space<vmem>>, vector<8x1xf32>,
    %c0_i32_8 = arith.constant 0 : i32
    %12 = arith.cmpi eq, %arg1, %c0_i32_8 : i32
    %13 = arith.extui %12 : i1 to i32
    %c0_i32_9 = arith.constant 0 : i32
    %14 = arith.cmpi ne, %13, %c0_i32_9 : i32
    scf.if %14 {
      %c0_10 = arith.constant 0 : index
      %c0_11 = arith.constant 0 : index
      %15 = vector.load %arg5[%c0_10, %c0_11] : memref<8x1xf32, #tpu.memory_space<vmem>>, vector<8x1xf32>
      %c0_12 = arith.constant 0 : index
      %c0_13 = arith.constant 0 : index
      %16 = vector.load %arg4[%c0_12, %c0_13] : memref<8x1xf32, #tpu.memory_space<vmem>>, vector<8x1xf32>
      tpu.vector_store %arg4[%c0_12, %c0_13], %15 {strides = array<i32>} : memref<8x1xf32, #tpu.memory_space<vmem>>, vector<8x1xf32>,
    } else {
    }
    return
  }
  func.func @transform_0(%arg0: i32, %arg1: i32) -> (i32, i32) {
    %c0_i32 = arith.constant 0 : i32
    return %arg0, %arg1 : i32, i32
  }
  func.func @transform_1(%arg0: i32, %arg1: i32) -> (i32, i32) {
    %c0_i32 = arith.constant 0 : i32
    return %arg0, %arg1 : i32, i32
  }
  func.func @transform_2(%arg0: i32, %arg1: i32) -> (i32, i32) {
    %c0_i32 = arith.constant 0 : i32
    %c0_i32_0 = arith.constant 0 : i32
    return %arg0, %c0_i32 : i32, i32
  }
}

</mosaic_0001>

<bundles_post_ra>
// kernel: tpu_custom_call.1
= control target key start
LH: loop header
LB: loop body
LE: loop exit
PB: predicated region body
PF: predicated region fallthrough
CT: control target
= control target key end

     0   :  { %7 = vsyncpa [#allocation4], 0  ;;  %s150_s0 = inlined_call_operand.hbm [shape: f32[8,32], index: 0, kind: input, shape index: {}]   ;;  %s151_s1 = inlined_call_operand.hbm [shape: f32[8,32], index: 1, kind: input, shape index: {}]   ;;  %s152_s2 = inlined_call_operand.vmem [shape: f32[8,1], index: 2, kind: output, shape index: {}]  }
   0x1   :  { %s14_s11 = sshll.u32 %s150_s0, 4  ;;  %s15_s11 = int_to_ptr.hbm [resolvable:$true] %s14_s11 }
   0x2   :  { %8 = vsyncpa [#allocation6], 0  ;;  %s123_s12 = smov [#allocation3]   ;;  %s25_s16 = sshll.u32 %s151_s1, 4  ;;  %s26_s16 = int_to_ptr.hbm [resolvable:$true] %s25_s16 }
   0x3   :  { %s16_s13 = sshll.u32 %s123_s12, 4  ;;  %s124_s17 = smov [#allocation5]   ;;  %s17_s13 = int_to_ptr.vmem [resolvable:$true] %s16_s13 }
   0x4   :  { %19 = dma.hbm_to_vmem [thread:$0]  %s15_s11, 128, %s17_s13, [#allocation4]  }
   0x5   :  { %s27_s18 = sshll.u32 %s124_s17, 4  ;;  %s28_s18 = int_to_ptr.vmem [resolvable:$true] %s27_s18 }
   0x6   :  { %30 = dma.hbm_to_vmem [thread:$0]  %s26_s16, 128, %s28_s18, [#allocation6]  }
   0x7   :  { %119 = dma.done.wait [#allocation4], 128  }
   0x8   :  { %120 = vsyncadd [#allocation4], 4294967168 }
   0x9   :  { %121 = dma.done.wait [#allocation6], 128  }
   0xa   :  { %122 = vsyncadd [#allocation6], 4294967168  ;;  %vm43_vm0 = vcmask 7168   ;;  %v125_v0 = vmov 0.0   ;;  %v45_v1 = vld [vmem:[#allocation3] sm:$0xff]  ;;  %v46_v2 = vld [vmem:[#allocation5] sm:$0xff] }
   0xb   :  { %44 = vst.msk [vmem:[#allocation2] sm:$0xff] %vm43_vm0, %v125_v0  ;;  %v47_v3 = vsub.f32 %v45_v1, %v46_v2  ;;  %vm50_vm1 = vcmask 261120  }
   0xd   :  { %v49_v4 = vmul.f32 %v47_v3, %v47_v3 }
   0xf   :  { %v51_v5 = vsel %vm50_vm1, %v49_v4, 0.0 }
  0x10   :  { %52 = vadd.xlane.f32.xlu0 %v51_v5 }
  0x12   :  { %v48_v6 = vld [vmem:[#allocation2] sm:$0xff] }
  0x83   :  { %v53_v7 = vpop.xlane.xlu0 %52 }
  0x84   :  { %v54_v8 = vadd.f32 %v53_v7, %v48_v6 }
  0x86   :  { %56 = vst.msk [vmem:[#allocation2] sm:$0xff] %vm43_vm0, %v54_v8 }
  0x8d   :  { %v60_v9 = vld [vmem:[#allocation2] sm:$0xff] }
  0x8e   :  { %61 = vst.msk [vmem:[%s152_s2] sm:$0xff] %vm43_vm0, %v60_v9 }
  0x8f   :  { %66 = vsyncpa [#allocation4], 1 }
  0x90   :  { %67 = vsyncpa [#allocation6], 1 }

</bundles_post_ra>
